<compile_context>
chip_gen: v7x
topology: tpu7x:2x2x1
jax: 0.10.0
libtpu: 0.0.40
codegen_flags: <defaults>
</compile_context>

<pallas_src>
import functools

import jax
import jax.numpy as jnp
from jax.experimental import pallas as pl
from jax.experimental.pallas import tpu as pltpu

_LANES = 128
_SUBLANES = 8
_TILE_BYTES = 4 * 1024 * 1024          # ~4 MiB per tile (per input, per buffer)
_MIN_KERNEL_ELEMS = 64 * 1024          # below this, closed form in plain jnp


def _tile_rows_cap(dtype) -> int:
    """Rows per tile so one tile is ~_TILE_BYTES at the input's native width."""
    itemsize = jnp.dtype(dtype).itemsize
    rows = _TILE_BYTES // (_LANES * itemsize)
    return max(_SUBLANES, (rows // _SUBLANES) * _SUBLANES)


def _sum_tiles_kernel(x_ref, out_ref, acc_ref, *, valid_rows_last):
    """Streams (tile_rows, 128) tiles and accumulates their sum.

    acc_ref : (1, 128) f32 VMEM accumulator (persists across the grid).
    out_ref : (1, 1) f32 scalar in SMEM, written once on the last step.
    valid_rows_last : compile-time number of valid rows in the final tile
        (== tile_rows when the row count divides evenly).
    """
    k = pl.program_id(0)
    nk = pl.num_programs(0)
    tile_rows = x_ref.shape[0]

    @pl.when(k == 0)
    def _init():
        acc_ref[...] = jnp.zeros_like(acc_ref)

    # Native dtype travels over HBM; cast to f32 only for the accumulate.
    x = x_ref[...].astype(jnp.float32)

    if valid_rows_last == tile_rows:
        # Every tile is fully valid: no masking anywhere.
        acc_ref[...] += jnp.sum(x, axis=0, keepdims=True)
    else:
        @pl.when(k < nk - 1)
        def _full():
            acc_ref[...] += jnp.sum(x, axis=0, keepdims=True)

        @pl.when(k == nk - 1)
        def _ragged():
            row = jax.lax.broadcasted_iota(jnp.int32, x.shape, 0)
            xm = jnp.where(row < valid_rows_last, x, jnp.float32(0.0))
            acc_ref[...] += jnp.sum(xm, axis=0, keepdims=True)

    @pl.when(k == nk - 1)
    def _finalize():
        out_ref[0, 0] = jnp.sum(acc_ref[...])


def _pallas_sum_f32(x):
    """Sum of all elements of `x`, accumulated in float32, via Pallas."""
    n = int(x.size)
    flat = jnp.ravel(x)                      # free bitcast for contiguous input

    if n % _LANES:
        # Rare unaligned case: zero-pad to a multiple of 128 lanes (zeros
        # contribute nothing to the sum).  Aligned sizes take the copy-free
        # reshape path below.
        flat = jnp.pad(flat, (0, _LANES - n % _LANES))

    rows = flat.shape[0] // _LANES
    x2d = flat.reshape(rows, _LANES)         # free bitcast

    tile_rows = min(_tile_rows_cap(x.dtype), rows)
    grid_k = -(-rows // tile_rows)           # cdiv
    valid_rows_last = rows - (grid_k - 1) * tile_rows

    kernel = functools.partial(_sum_tiles_kernel,
                               valid_rows_last=valid_rows_last)

    out = pl.pallas_call(
        kernel,
        out_shape=jax.ShapeDtypeStruct((1, 1), jnp.float32),
        grid=(grid_k,),
        in_specs=[pl.BlockSpec((tile_rows, _LANES), lambda k: (k, 0))],
        out_specs=pl.BlockSpec((1, 1), lambda k: (0, 0),
                               memory_space=pltpu.MemorySpace.SMEM),
        scratch_shapes=[pltpu.VMEM((1, _LANES), jnp.float32)],
        compiler_params=pltpu.CompilerParams(
            dimension_semantics=("arbitrary",)),   # reduction axis
    )(x2d)
    return out[0, 0]


def discriminator_loss(orig_preds, recon_preds, *,
                       min_kernel_elems=_MIN_KERNEL_ELEMS):
    """Pallas TPU implementation of DiscriminatorLoss.forward."""
    n_o = int(orig_preds.size)
    n_r = int(recon_preds.size)
    assert n_o > 0 and n_r > 0

    def total(x):
        if int(x.size) < min_kernel_elems:
            # Launch + pipeline prologue would dominate for tiny inputs.
            return jnp.sum(x.astype(jnp.float32))
        return _pallas_sum_f32(x)

    s_o = total(orig_preds)
    s_r = total(recon_preds)

    # BCE(input=1, target=o) == 100*(1-o);  BCE(input=0, target=r) == 100*r.
    orig_loss = jnp.float32(100.0) * (jnp.float32(n_o) - s_o) / jnp.float32(n_o)
    recon_loss = jnp.float32(100.0) * s_r / jnp.float32(n_r)
    return (orig_loss + recon_loss) * jnp.float32(0.5)


def _reference(orig_preds, recon_preds):
    """Pure-JAX mirror of the torch module (BCE with log clamped at -100)."""
    def bce(inp, tgt):
        log_i = jnp.maximum(jnp.log(inp), -100.0)
        log_1mi = jnp.maximum(jnp.log1p(-inp), -100.0)
        return jnp.mean(-(tgt * log_i + (1.0 - tgt) * log_1mi))

    orig_loss = bce(jnp.ones_like(orig_preds), orig_preds)
    recon_loss = bce(jnp.zeros_like(recon_preds), recon_preds)
    return (orig_loss + recon_loss) / 2.0


if __name__ == "__main__":
    key = jax.random.PRNGKey(0)
    k1, k2, k3, k4, k5, k6, k7 = jax.random.split(key, 7)

    def uniform(k, shape, dtype=jnp.float32):
        return jax.random.uniform(k, shape, dtype=jnp.float32,
                                  minval=0.01, maxval=0.99).astype(dtype)

    # 1) Small patch-discriminator-style predictions (2,1,16,16).
    o_small = uniform(k1, (2, 1, 16, 16))
    r_small = uniform(k2, (2, 1, 16, 16))
    ref_small = jax.block_until_ready(
        _reference(o_small.astype(jnp.float32), r_small.astype(jnp.float32)))
    #   fast path (production default for tiny inputs) ...
    loss_fast = jax.block_until_ready(discriminator_loss(o_small, r_small))
    assert jnp.allclose(loss_fast, ref_small, rtol=1e-4, atol=1e-4), (
        loss_fast, ref_small)
    #   ... and the Pallas kernel path forced on the same small input.
    loss_kernel = jax.block_until_ready(
        discriminator_loss(o_small, r_small, min_kernel_elems=0))
    assert jnp.allclose(loss_kernel, ref_small, rtol=1e-4, atol=1e-4), (
        loss_kernel, ref_small)

    # 2) Mismatched sizes + multi-tile grid with a ragged last tile
    #    (orig: 1,179,648 elems -> 9216 rows -> 2 tiles of 8192 rows;
    #     recon: 786,432 elems -> 6144 rows -> single full-dim tile).
    o_med = uniform(k3, (2, 1, 768, 768))
    r_med = uniform(k4, (2, 1, 512, 768))
    loss_med = jax.block_until_ready(discriminator_loss(o_med, r_med))
    ref_med = jax.block_until_ready(_reference(o_med, r_med))
    assert jnp.allclose(loss_med, ref_med, rtol=1e-4, atol=1e-4), (
        loss_med, ref_med)

    # 3) Lane-unaligned element count (exercises the padded fallback).
    o_odd = uniform(k5, (3, 1, 181, 181))   # 98,283 elems, not a mult. of 128
    r_odd = uniform(k6, (3, 1, 181, 181))
    loss_odd = jax.block_until_ready(discriminator_loss(o_odd, r_odd))
    ref_odd = jax.block_until_ready(_reference(o_odd, r_odd))
    assert jnp.allclose(loss_odd, ref_odd, rtol=1e-4, atol=1e-4), (
        loss_odd, ref_odd)

    # 4) bf16 predictions stay bf16 on the HBM->VMEM path (wider tiles).
    o_bf = uniform(k7, (8, 1, 128, 128), dtype=jnp.bfloat16)
    r_bf = uniform(k1, (8, 1, 128, 128), dtype=jnp.bfloat16)
    loss_bf = jax.block_until_ready(discriminator_loss(o_bf, r_bf))
    ref_bf = jax.block_until_ready(
        _reference(o_bf.astype(jnp.float32), r_bf.astype(jnp.float32)))
    assert jnp.allclose(loss_bf, ref_bf, rtol=1e-3, atol=1e-3), (loss_bf, ref_bf)

    print("KERNEL_OK")
</pallas_src>

<mosaic_0001>
module attributes {stable_mosaic.version = 11 : i64} {
  func.func @_sum_tiles_kernel(%arg0: i32, %arg1: memref<4x128xf32, #tpu.memory_space<vmem>>, %arg2: memref<1x1xf32, #tpu.memory_space<smem>>, %arg3: memref<1x128xf32, #tpu.memory_space<vmem>>) attributes {dimension_semantics = [#tpu.dimension_semantics<arbitrary>], iteration_bounds = array<i64: 1>, scalar_prefetch = 0 : i64, scratch_operands = 1 : i64, tpu.core_type = #tpu.core_type<tc>, window_params = [{transform_indices = @transform_0, window_bounds = array<i64: 4, 128>}, {transform_indices = @transform_1, window_bounds = array<i64: 1, 1>}]} {
    %c0_i32 = arith.constant 0 : i32
    %0 = arith.cmpi eq, %arg0, %c0_i32 : i32
    %1 = arith.extui %0 : i1 to i32
    %c0_i32_0 = arith.constant 0 : i32
    %2 = arith.cmpi ne, %1, %c0_i32_0 : i32
    scf.if %2 {
      %cst_8 = arith.constant 0.000000e+00 : f32
      %12 = vector.broadcast %cst_8 : f32 to vector<1x128xf32>
      %c0_9 = arith.constant 0 : index
      %c0_10 = arith.constant 0 : index
      %13 = vector.load %arg3[%c0_9, %c0_10] : memref<1x128xf32, #tpu.memory_space<vmem>>, vector<1x128xf32>
      tpu.vector_store %arg3[%c0_9, %c0_10], %12 {strides = array<i32>} : memref<1x128xf32, #tpu.memory_space<vmem>>, vector<1x128xf32>,
    } else {
    }
    %c0 = arith.constant 0 : index
    %c0_1 = arith.constant 0 : index
    %3 = vector.load %arg1[%c0, %c0_1] : memref<4x128xf32, #tpu.memory_space<vmem>>, vector<4x128xf32>
    %c0_2 = arith.constant 0 : index
    %c0_3 = arith.constant 0 : index
    %4 = vector.load %arg3[%c0_2, %c0_3] : memref<1x128xf32, #tpu.memory_space<vmem>>, vector<1x128xf32>
    %cst = arith.constant dense<0.000000e+00> : vector<128xf32>
    %5 = vector.multi_reduction <add>, %3, %cst [0] : vector<4x128xf32> to vector<128xf32>
    %6 = vector.shape_cast %5 : vector<128xf32> to vector<1x128xf32>
    %7 = arith.addf %4, %6 : vector<1x128xf32>
    %c0_4 = arith.constant 0 : index
    %c0_5 = arith.constant 0 : index
    %8 = vector.load %arg3[%c0_4, %c0_5] : memref<1x128xf32, #tpu.memory_space<vmem>>, vector<1x128xf32>
    tpu.vector_store %arg3[%c0_4, %c0_5], %7 {strides = array<i32>} : memref<1x128xf32, #tpu.memory_space<vmem>>, vector<1x128xf32>,
    %c0_i32_6 = arith.constant 0 : i32
    %9 = arith.cmpi eq, %arg0, %c0_i32_6 : i32
    %10 = arith.extui %9 : i1 to i32
    %c0_i32_7 = arith.constant 0 : i32
    %11 = arith.cmpi ne, %10, %c0_i32_7 : i32
    scf.if %11 {
      %c0_8 = arith.constant 0 : index
      %c0_9 = arith.constant 0 : index
      %12 = vector.load %arg3[%c0_8, %c0_9] : memref<1x128xf32, #tpu.memory_space<vmem>>, vector<1x128xf32>
      %13 = vector.shape_cast %12 : vector<1x128xf32> to vector<1x1x128xf32>
      %cst_10 = arith.constant dense<0.000000e+00> : vector<1xf32>
      %14 = vector.multi_reduction <add>, %13, %cst_10 [1, 2] : vector<1x1x128xf32> to vector<1xf32>
      %15 = vector.shape_cast %14 : vector<1xf32> to vector<1x1x1xf32>
      %16 = vector.extract %15[0, 0, 0] : f32 from vector<1x1x1xf32>
      %c0_11 = arith.constant 0 : index
      %c0_12 = arith.constant 0 : index
      %17 = memref.load %arg2[%c0_11, %c0_12] : memref<1x1xf32, #tpu.memory_space<smem>>
      memref.store %16, %arg2[%c0_11, %c0_12] : memref<1x1xf32, #tpu.memory_space<smem>>
    } else {
    }
    return
  }
  func.func @transform_0(%arg0: i32) -> (i32, i32) {
    %c0_i32 = arith.constant 0 : i32
    %c0_i32_0 = arith.constant 0 : i32
    return %arg0, %c0_i32 : i32, i32
  }
  func.func @transform_1(%arg0: i32) -> (i32, i32) {
    %c0_i32 = arith.constant 0 : i32
    %c0_i32_0 = arith.constant 0 : i32
    %c0_i32_1 = arith.constant 0 : i32
    return %c0_i32, %c0_i32_0 : i32, i32
  }
}

</mosaic_0001>

<bundles_post_ra>
// kernel: tpu_custom_call.1
= control target key start
LH: loop header
LB: loop body
LE: loop exit
PB: predicated region body
PF: predicated region fallthrough
CT: control target
= control target key end

     0   :  { %6 = vsyncpa [#allocation4], 0  ;;  %s147_s0 = inlined_call_operand.hbm [shape: f32[4,128], index: 0, kind: input, shape index: {}]   ;;  %s148_s1 = inlined_call_operand.hbm [shape: f32[1,1], index: 1, kind: output, shape index: {}]  }
   0x1   :  { %7 = vsyncpa [#allocation5], 0  ;;  %s110_s6 = smov [#allocation3]   ;;  %s74_s10 = scalar_lea.hbm %s147_s0, 64 }
   0x2   :  { %s14_s7 = sshll.u32 %s110_s6, 4  ;;  %p75_p0 = scmp.ne.s32.totalorder %s147_s0, %s74_s10  ;;  %s15_s7 = int_to_ptr.vmem [resolvable:$true] %s14_s7 }
   0x3   :  { %p78_p1 = scmp.lt.u32.totalorder %s74_s10, %s147_s0 }
   0x5   :  { %p80_p2 = pnand %p78_p1, %p75_p0 }
   0x7   :  { %83 = shalt.err (!%p80_p2)
}
   0x8   :  { %s84_s15 = scalar_lea.vmem %s15_s7, 64  ;;  %p89_p4 = scmp.lt.s32.totalorder %s15_s7, %s15_s7 }
   0x9   :  { %p85_p3 = scmp.ne.s32.totalorder %s15_s7, %s84_s15  ;;  %p90_p5 = scmp.lt.s32.totalorder %s84_s15, %s84_s15 }
   0xb   :  { %p91_p6 = por %p90_p5, %p89_p4 }
   0xd   :  { %p92_p7 = pnand %p91_p6, %p85_p3 }
   0xf   :  { %95 = shalt.err (!%p92_p7)
}
  0x10   :  { %17 = dma.hbm_to_vmem [thread:$0]  %s147_s0, 64, %s15_s7, [#allocation4]  }
  0x11   :  { %106 = dma.done.wait [#allocation4], 64  }
  0x12   :  { %107 = vsyncadd [#allocation4], 4294967232  ;;  %v111_v0 = vmov 0.0   ;;  %vm28_vm0 = vcmask 1043456   ;;  %v26_v1 = vld [vmem:[#allocation3] sm:$0xf] }
  0x13   :  { %25 = vst [vmem:[#allocation2] sm:$0x1] %v111_v0  ;;  %v29_v2 = vsel %vm28_vm0, %v26_v1, 0.0  ;;  %vm42_vm1 = vcmask 1040384   ;;  %s96_s20 = scalar_lea.hbm %s148_s1, 16 }
  0x14   :  { %v30_v3 = vrot.slane %v29_v2, 4  ;;  %p97_p8 = scmp.ne.s32.totalorder %s148_s1, %s96_s20  ;;  %p100_p9 = scmp.lt.u32.totalorder %s96_s20, %s148_s1 }
  0x16   :  { %v31_v4 = vadd.f32 %v30_v3, %v29_v2  ;;  %p102_p10 = pnand %p100_p9, %p97_p8 }
  0x18   :  { %v32_v5 = vrot.slane %v31_v4, 2 }
  0x1a   :  { %v33_v6 = vadd.f32 %v32_v5, %v31_v4  ;;  %v27_v8 = vld [vmem:[#allocation2] sm:$0x1] }
  0x1c   :  { %v34_v7 = vrot.slane %v33_v6, 1 }
  0x1e   :  { %v35_v9 = vadd.f32 %v34_v7, %v33_v6 }
  0x20   :  { %v36_v10 = vadd.f32 %v35_v9, %v27_v8 }
  0x22   :  { %37 = vst [vmem:[#allocation2] sm:$0x1] %v36_v10 }
  0x29   :  { %v41_v11 = vld [vmem:[#allocation2] sm:$0x1] }
  0x2a   :  { %v43_v12 = vsel %vm42_vm1, %v41_v11, 0.0 }
  0x2b   :  { %44 = vadd.xlane.f32.xlu0 %v43_v12 }
  0xb8   :  { %v45_v13 = vpop.xlane.xlu0 %44 }
  0xb9   :  { %v46_v14 = vrot.slane %v45_v13, 4 }
  0xbb   :  { %v47_v15 = vadd.f32 %v46_v14, %v45_v13 }
  0xbd   :  { %v48_v16 = vrot.slane %v47_v15, 2 }
  0xbf   :  { %v49_v17 = vadd.f32 %v48_v16, %v47_v15 }
  0xc1   :  { %v50_v18 = vrot.slane %v49_v17, 1 }
  0xc3   :  { %v51_v19 = vadd.f32 %v50_v18, %v49_v17 }
  0xc5   :  { %69 = vpush %v51_v19 }
  0xf6   :  { %s70_s0 = spop %69 }
  0xf7   :  { %54 = sst [smem:[#allocation6]] %s70_s0 }
  0xf8   :  { %105 = shalt.err (!%p102_p10)
}
  0xf9   :  { %s112_s25 = smov [#allocation6]  }
  0xfa   :  { %62 = dma.smem_to_hbm %s112_s25, 16, %s148_s1, [#allocation5]  }
  0xfb   :  { %108 = dma.done.wait [#allocation5], 16  }
  0xfc   :  { %109 = vsyncadd [#allocation5], 4294967280 }
  0xfd   :  { %66 = sfence }
  0xfe   :  { %67 = vsyncpa [#allocation4], 1 }
  0xff   :  { %68 = vsyncpa [#allocation5], 1 }

</bundles_post_ra>
